<compile_context>
chip_gen: v6e
topology: v6e:2x2x1
jax: 0.10.0
libtpu: 0.0.40
codegen_flags: <defaults>
</compile_context>

<pallas_src>
import math

import jax
import jax.numpy as jnp
from jax.experimental import pallas as pl
from jax.experimental.pallas import tpu as pltpu


def _round_up(x, m):
    return ((x + m - 1) // m) * m


def _embed_kernel(ids_ref, w_ref, o_ref):
    # ids_ref: (TILE_N, 1) int32      token ids for this row tile
    # w_ref  : (d_model, Vp) float    full embedding table, resident in VMEM
    # o_ref  : (TILE_N, d_model)      gathered embeddings
    tile_n = ids_ref.shape[0]
    vp = w_ref.shape[1]

    ids = ids_ref[...]                                                # (TILE_N, 1)
    vocab_iota = jax.lax.broadcasted_iota(jnp.int32, (tile_n, vp), 1)
    onehot = (vocab_iota == ids).astype(w_ref.dtype)                  # (TILE_N, Vp)

    # out[n, d] = sum_v onehot[n, v] * W_E[d, v]
    # Contract on the vocab axis of W_E directly -> no wrapper transpose.
    o_ref[...] = jax.lax.dot_general(
        onehot,
        w_ref[...],
        dimension_numbers=(((1,), (1,)), ((), ())),
        preferred_element_type=jnp.float32,
    ).astype(o_ref.dtype)


def embed_forward(x, W_E, *, tile_n_max=256):
    """Pallas equivalent of Embed.forward.

    x   : (B, P) integer token ids in [0, d_vocab)
    W_E : (d_model, d_vocab) float
    returns (B, P, d_model)

    Note: ids outside [0, d_vocab) produce an all-zero row (one-hot matches
    nothing) instead of raising like PyTorch indexing.
    """
    B, P = x.shape
    d_model, d_vocab = W_E.shape
    N = B * P

    # --- pad vocab (contraction / lane dim) to a multiple of 128 with zeros.
    d_vocab_pad = _round_up(d_vocab, 128)
    if d_vocab_pad != d_vocab:
        W = jnp.pad(W_E, ((0, 0), (0, d_vocab_pad - d_vocab)))
    else:
        W = W_E

    # --- choose a large row tile (multiple of 8) and pad N to a whole tile.
    if N <= tile_n_max:
        tile_n = _round_up(N, 8)
    else:
        tile_n = tile_n_max
    n_pad = _round_up(N, tile_n)
    grid = n_pad // tile_n

    ids = x.reshape(N).astype(jnp.int32)
    if n_pad != N:
        ids = jnp.pad(ids, (0, n_pad - N))          # id 0 is valid; rows are discarded
    ids = ids.reshape(n_pad, 1)

    # --- explicit VMEM budget: table (single-buffered) + pipelined id/out tiles
    # + one-hot intermediate, clamped to stay inside every generation's VMEM.
    itemsize = jnp.dtype(W_E.dtype).itemsize
    w_bytes = d_model * d_vocab_pad * itemsize
    out_tile_bytes = tile_n * d_model * 4
    onehot_bytes = tile_n * d_vocab_pad * 4
    ids_bytes = tile_n * 4
    est = w_bytes + 2 * (out_tile_bytes + ids_bytes) + 2 * onehot_bytes + (4 << 20)
    vmem_limit = int(min(max(est, 32 << 20), 48 << 20))

    out_flat = pl.pallas_call(
        _embed_kernel,
        out_shape=jax.ShapeDtypeStruct((n_pad, d_model), W_E.dtype),
        grid_spec=pltpu.PrefetchScalarGridSpec(
            num_scalar_prefetch=0,
            grid=(grid,),
            in_specs=[
                pl.BlockSpec((tile_n, 1), lambda i: (i, 0)),
                # Whole table resident in VMEM, copied once (no per-step
                # re-DMA, no double buffering of a constant block).
                pl.BlockSpec(memory_space=pltpu.MemorySpace.VMEM),
            ],
            out_specs=pl.BlockSpec((tile_n, d_model), lambda i: (i, 0)),
        ),
        compiler_params=pltpu.CompilerParams(
            dimension_semantics=("parallel",),
            vmem_limit_bytes=vmem_limit,
        ),
    )(ids, W)

    return out_flat[:N].reshape(B, P, d_model)


def _reference(x, W_E):
    # einsum('dbp -> bpd', W_E[:, x]) == W_E.T[x]
    return jnp.take(W_E.T, x, axis=0)


if __name__ == "__main__":
    key = jax.random.PRNGKey(0)
    k_w, k_x1, k_x2 = jax.random.split(key, 3)

    # Grokking-style dims (small).
    d_vocab, d_model = 113, 128
    W_E = jax.random.normal(k_w, (d_model, d_vocab), dtype=jnp.float32) / math.sqrt(d_model)

    # Case 1: tiny batch, single grid step.
    B1, P1 = 2, 8
    x1 = jax.random.randint(k_x1, (B1, P1), minval=0, maxval=d_vocab, dtype=jnp.int32)
    out1 = jax.block_until_ready(embed_forward(x1, W_E))
    ref1 = _reference(x1, W_E)
    assert out1.shape == (B1, P1, d_model), out1.shape
    assert jnp.allclose(out1, ref1, atol=1e-6, rtol=1e-6), "mismatch vs reference (case 1)"

    # Case 2: ragged N (B*P not a multiple of the tile) and a multi-step grid.
    B2, P2 = 3, 50                    # N = 150 -> padded to 192 with tile_n=64
    x2 = jax.random.randint(k_x2, (B2, P2), minval=0, maxval=d_vocab, dtype=jnp.int32)
    out2 = jax.block_until_ready(embed_forward(x2, W_E, tile_n_max=64))
    ref2 = _reference(x2, W_E)
    assert out2.shape == (B2, P2, d_model), out2.shape
    assert jnp.allclose(out2, ref2, atol=1e-6, rtol=1e-6), "mismatch vs reference (case 2)"

    print("KERNEL_OK")
</pallas_src>

<mosaic_0001>
module attributes {stable_mosaic.version = 11 : i64} {
  func.func @_embed_kernel(%arg0: i32, %arg1: memref<16x1xi32, #tpu.memory_space<vmem>>, %arg2: memref<128x128xf32, #tpu.memory_space<vmem>>, %arg3: memref<16x128xf32, #tpu.memory_space<vmem>>) attributes {dimension_semantics = [#tpu.dimension_semantics<parallel>], iteration_bounds = array<i64: 1>, scalar_prefetch = 0 : i64, scratch_operands = 0 : i64, tpu.core_type = #tpu.core_type<tc>, window_params = [{transform_indices = @transform_0, window_bounds = array<i64: 16, 1>}, {pipeline_mode = #tpu.pipeline_mode<synchronous>, transform_indices = @transform_1, window_bounds = array<i64: 128, 128>}, {transform_indices = @transform_2, window_bounds = array<i64: 16, 128>}]} {
    %c0 = arith.constant 0 : index
    %c0_0 = arith.constant 0 : index
    %0 = vector.load %arg1[%c0, %c0_0] : memref<16x1xi32, #tpu.memory_space<vmem>>, vector<16x1xi32>
    %1 = tpu.iota {dimensions = array<i32: 1>} : vector<16x128xi32>
    %2 = vector.broadcast %0 : vector<16x1xi32> to vector<16x128xi32>
    %3 = arith.cmpi eq, %1, %2 : vector<16x128xi32>
    %4 = arith.extui %3 : vector<16x128xi1> to vector<16x128xi32>
    %5 = arith.sitofp %4 : vector<16x128xi32> to vector<16x128xf32>
    %c0_1 = arith.constant 0 : index
    %c0_2 = arith.constant 0 : index
    %6 = vector.load %arg2[%c0_1, %c0_2] : memref<128x128xf32, #tpu.memory_space<vmem>>, vector<128x128xf32>
    %cst = arith.constant dense<0.000000e+00> : vector<16x128xf32>
    %7 = tpu.matmul %5, %6, %cst {dimension_numbers = #tpu.dot_dimension_numbers<[1], [1], [0], [0], [0, 0, 1, 0], [], []>} : vector<16x128xf32>, vector<128x128xf32>, vector<16x128xf32> -> vector<16x128xf32>
    %c0_3 = arith.constant 0 : index
    %c0_4 = arith.constant 0 : index
    %8 = vector.load %arg3[%c0_3, %c0_4] : memref<16x128xf32, #tpu.memory_space<vmem>>, vector<16x128xf32>
    tpu.vector_store %arg3[%c0_3, %c0_4], %7 {strides = array<i32>} : memref<16x128xf32, #tpu.memory_space<vmem>>, vector<16x128xf32>,
    return
  }
  func.func @transform_0(%arg0: i32) -> (i32, i32) {
    %c0_i32 = arith.constant 0 : i32
    %c0_i32_0 = arith.constant 0 : i32
    return %arg0, %c0_i32 : i32, i32
  }
  func.func @transform_1(%arg0: i32) -> (i32, i32) {
    %c0_i32 = arith.constant 0 : i32
    %c0_i32_0 = arith.constant 0 : i32
    %c0_i32_1 = arith.constant 0 : i32
    return %c0_i32, %c0_i32_0 : i32, i32
  }
  func.func @transform_2(%arg0: i32) -> (i32, i32) {
    %c0_i32 = arith.constant 0 : i32
    %c0_i32_0 = arith.constant 0 : i32
    return %arg0, %c0_i32 : i32, i32
  }
}

</mosaic_0001>

<bundles_post_ra>
// kernel: tpu_custom_call.1
= control target key start
LH: loop header
LB: loop body
LE: loop exit
PB: predicated region body
PF: predicated region fallthrough
CT: control target
= control target key end

     0   :  { %7 = vsyncpa [#allocation3], 0  ;;  %s299_s0 = inlined_call_operand.vmem [shape: s32[16,1], index: 0, kind: input, shape index: {}]   ;;  %s300_s1 = inlined_call_operand.hbm [shape: f32[128,128], index: 1, kind: input, shape index: {}]   ;;  %s301_s2 = inlined_call_operand.hbm [shape: f32[16,128], index: 2, kind: output, shape index: {}]  }
   0x1   :  { %8 = vsyncpa [#allocation4], 0  ;;  %s260_s9 = smov [#allocation2]  }
   0x2   :  { %s16_s10 = sshll.u32 %s260_s9, 4  ;;  %s17_s10 = int_to_ptr.vmem [resolvable:$true] %s16_s10 }
   0x3   :  { %s224_s11 = scalar_lea.vmem %s17_s10, 2048  ;;  %p229_p1 = scmp.lt.s32.totalorder %s17_s10, %s17_s10 }
   0x4   :  { %p225_p0 = scmp.ne.s32.totalorder %s17_s10, %s224_s11  ;;  %p230_p2 = scmp.lt.s32.totalorder %s224_s11, %s224_s11 }
   0x6   :  { %p231_p3 = por %p230_p2, %p229_p1 }
   0x8   :  { %p232_p4 = pnand %p231_p3, %p225_p0 }
   0xa   :  { %235 = shalt.err (!%p232_p4)
}
   0xb   :  { %s261_s12 = smov 128   ;;  %s262_s13 = smov 8  }
   0xc   :  { %22 = dma.hbm_to_vmem [thread:$0]  %s300_s1, 2048, %s17_s10, [#allocation3], %s261_s12, %s261_s12, %s262_s13  }
   0xd   :  { %256 = dma.done.wait [#allocation3], 2048  }
   0xe   :  { %257 = vsyncadd [#allocation3], 4294965248  ;;  %v263_v0 = vmov 0   ;;  %v26_v1 = vld [vmem:[%s299_s0] sm:$0xff]  ;;  %v57_v2 = vld [vmem:[#allocation2 + $0x78] sm:$0xff]  ;;  %v28_v19 = vlaneseq  ;;  %v264_v22 = vmov 1.0  }
   0xf   :  { %215 = vset.pattern.permute.xlu0 %v263_v0  ;;  %174 = vmatprep.subr.mxu0 %v57_v2  ;;  %v56_v3 = vld [vmem:[#allocation2 + $0x70] sm:$0xff]  ;;  %v27_v4 = vld [vmem:[%s299_s0 + $0x8] sm:$0xff]  ;;  %v54_v6 = vld [vmem:[#allocation2 + $0x60] sm:$0xff]  ;;  %s265_s0 = smov [#allocation5]  }
  0x10   :  { %31 = vperm.xlu0 %215, %v26_v1   ;;  %175 = vmatpush3.xpose.msra.mxu0 %v57_v2  ;;  %v55_v5 = vld [vmem:[#allocation2 + $0x68] sm:$0xff]  ;;  %v53_v7 = vld [vmem:[#allocation2 + $0x58] sm:$0xff]  ;;  %v52_v8 = vld [vmem:[#allocation2 + $0x50] sm:$0xff]  ;;  %v29_v20 = vand.u32 127, %v28_v19  ;;  %s140_s1 = sshll.u32 %s265_s0, 4  ;;  %s141_s1 = int_to_ptr.vmem [resolvable:$true] %s140_s1 }
  0x11   :  { %176 = vmatprep.subr.mxu0 %v56_v3  ;;  %v51_v9 = vld [vmem:[#allocation2 + $0x48] sm:$0xff]  ;;  %v50_v10 = vld [vmem:[#allocation2 + $0x40] sm:$0xff]  ;;  %v49_v11 = vld [vmem:[#allocation2 + $0x38] sm:$0xff]  ;;  %s236_s20 = scalar_lea.vmem %s141_s1, 256  ;;  %p241_p6 = scmp.lt.s32.totalorder %s141_s1, %s141_s1 }
  0x12   :  { %v48_v12 = vld [vmem:[#allocation2 + $0x30] sm:$0xff]  ;;  %v47_v13 = vld [vmem:[#allocation2 + $0x28] sm:$0xff]  ;;  %v46_v14 = vld [vmem:[#allocation2 + $0x20] sm:$0xff]  ;;  %p237_p5 = scmp.ne.s32.totalorder %s141_s1, %s236_s20  ;;  %p242_p7 = scmp.lt.s32.totalorder %s236_s20, %s236_s20 }
  0x13   :  { %v45_v15 = vld [vmem:[#allocation2 + $0x18] sm:$0xff]  ;;  %v44_v16 = vld [vmem:[#allocation2 + $0x10] sm:$0xff]  ;;  %v43_v17 = vld [vmem:[#allocation2 + $0x8] sm:$0xff] }
  0x14   :  { %34 = vperm.xlu0 %215, %v27_v4   ;;  %177 = vmatpush3.xpose.msra.mxu0 %v56_v3  ;;  %v42_v18 = vld [vmem:[#allocation2] sm:$0xff]  ;;  %p243_p8 = por %p242_p7, %p241_p6 }
  0x15   :  { %178 = vmatprep.subr.mxu0 %v55_v5 }
  0x16   :  { %p244_p9 = pnand %p243_p8, %p237_p5 }
  0x18   :  { %179 = vmatpush3.xpose.msra.mxu0 %v55_v5 }
  0x19   :  { %180 = vmatprep.subr.mxu0 %v54_v6 }
  0x1c   :  { %181 = vmatpush3.xpose.msra.mxu0 %v54_v6 }
  0x1d   :  { %182 = vmatprep.subr.mxu0 %v53_v7 }
  0x20   :  { %183 = vmatpush3.xpose.msra.mxu0 %v53_v7 }
  0x21   :  { %184 = vmatprep.subr.mxu0 %v52_v8 }
  0x24   :  { %185 = vmatpush3.xpose.msra.mxu0 %v52_v8 }
  0x25   :  { %186 = vmatprep.subr.mxu0 %v51_v9 }
  0x28   :  { %187 = vmatpush3.xpose.msra.mxu0 %v51_v9 }
  0x29   :  { %188 = vmatprep.subr.mxu0 %v50_v10 }
  0x2c   :  { %189 = vmatpush3.xpose.msra.mxu0 %v50_v10 }
  0x2d   :  { %190 = vmatprep.subr.mxu0 %v49_v11 }
  0x30   :  { %191 = vmatpush3.xpose.msra.mxu0 %v49_v11 }
  0x31   :  { %192 = vmatprep.subr.mxu0 %v48_v12 }
  0x34   :  { %193 = vmatpush3.xpose.msra.mxu0 %v48_v12 }
  0x35   :  { %194 = vmatprep.subr.mxu0 %v47_v13 }
  0x38   :  { %195 = vmatpush3.xpose.msra.mxu0 %v47_v13 }
  0x39   :  { %196 = vmatprep.subr.mxu0 %v46_v14 }
  0x3c   :  { %197 = vmatpush3.xpose.msra.mxu0 %v46_v14 }
  0x3d   :  { %198 = vmatprep.subr.mxu0 %v45_v15 }
  0x40   :  { %199 = vmatpush3.xpose.msra.mxu0 %v45_v15 }
  0x41   :  { %200 = vmatprep.subr.mxu0 %v44_v16 }
  0x44   :  { %201 = vmatpush3.xpose.msra.mxu0 %v44_v16 }
  0x45   :  { %202 = vmatprep.subr.mxu0 %v43_v17 }
  0x48   :  { %203 = vmatpush3.xpose.msra.mxu0 %v43_v17 }
  0x49   :  { %204 = vmatprep.subr.mxu0 %v42_v18 }
  0x4c   :  { %205 = vmatpush3.xpose.msra.mxu0 %v42_v18 }
  0x8b   :  { %v32_v21 = vpop.permute.xlu0 %31 }
  0x8c   :  { %vm36_vm0 = vcmp.eq.s32.totalorder %v29_v20, %v32_v21 }
  0x8d   :  { %206 = vmatprep.mubr.msk.f32.mxu0 %vm36_vm0, %v264_v22 }
  0x8f   :  { %v35_v23 = vpop.permute.xlu0 %34 }
  0x90   :  { %vm37_vm1 = vcmp.eq.s32.totalorder %v29_v20, %v35_v23 }
  0x91   :  { %207 = vmatmul.mubr.msk.f32.vlgmr.msra.gmra.mxu0 %vm37_vm1, %v264_v22 }
 0x151   :  { %v208_v24 = vpop.f32.mrf.mxu0 }
 0x152   :  { %134 = vst [vmem:[#allocation5 + $0x8] sm:$0xff] %v208_v24 }
 0x153   :  { %v124_v25 = vpop.f32.mrf.mxu0 }
 0x154   :  { %133 = vst [vmem:[#allocation5] sm:$0xff] %v124_v25 }
 0x155   :  { %247 = shalt.err (!%p244_p9)
}
 0x156   :  { %146 = dma.vmem_to_hbm [thread:$0]  %s141_s1, 256, %s301_s2, [#allocation4], %s261_s12, %s261_s12, %s262_s13  }
 0x157   :  { %258 = dma.done.wait [#allocation4], 256  }
 0x158   :  { %259 = vsyncadd [#allocation4], 4294967040 }
 0x159   :  { %150 = vsyncpa [#allocation3], 1 }
 0x15a   :  { %151 = vsyncpa [#allocation4], 1 }

</bundles_post_ra>
